<compile_context>
chip_gen: v7x
topology: tpu7x:2x2x1
jax: 0.10.0
libtpu: 0.0.40
codegen_flags: <defaults>
</compile_context>

<pallas_src>
import functools

import jax
import jax.numpy as jnp
from jax.experimental import pallas as pl
from jax.experimental.pallas import tpu as pltpu


# --------------------------------------------------------------------------
# helpers
# --------------------------------------------------------------------------
def _round_up(v, m):
    return ((v + m - 1) // m) * m


def _vmem_capacity_bytes():
    """Physical VMEM per TensorCore (v5e/v6e: 128 MiB, v7x: 64 MiB)."""
    try:
        info = pltpu.get_tpu_info()
        v = getattr(info, "vmem_capacity_bytes", None)
        if isinstance(v, int) and v > 0:
            return v
    except Exception:
        pass
    return 64 * 1024 * 1024            # conservative default (v7x)


def _num_tensorcores():
    """TensorCores per chip (v5e/v6e: 1, v7x: 2).  Best-effort query."""
    try:
        info = pltpu.get_tpu_info()
        for name in ("num_cores", "core_count", "tensorcore_count",
                     "num_tensorcores", "cores_per_chip"):
            v = getattr(info, name, None)
            if isinstance(v, int) and v > 0:
                return v
    except Exception:
        pass
    return 1                           # safe default: no forced grid split


def _fused_vmem_estimate(tm, k0_pad, weights, biases, n_out):
    """VMEM bytes for the fused path: single-buffered resident params +
    double-buffered bf16 input / f32 output tiles + per-layer f32 accumulator
    and bf16 copy of the hidden activation (conservative)."""
    param = sum(int(w.size) * w.dtype.itemsize for w in weights)
    param += sum(int(b.size) * b.dtype.itemsize for b in biases)
    x_tile = 2 * tm * k0_pad * 2                       # bf16, 2 pipeline bufs
    o_tile = 2 * tm * n_out * 4                        # f32,  2 pipeline bufs
    hidden = sum(tm * int(w.shape[1]) * (4 + 2) for w in weights)
    return param + x_tile + o_tile + hidden


def _choose_fused_tm(m, k0_pad, weights, biases, n_out, budget, n_cores):
    """Pick the largest batch tile (multiple of 8) whose fused-path footprint
    fits `budget`; return None if even the smallest tile does not fit.
    On multi-TensorCore chips (v7x) split M so both cores get a tile."""
    full = m if m <= 8 else _round_up(m, 8)
    cands = sorted({min(full, c) for c in (512, 256, 128, 64, 32, 16, 8)},
                   reverse=True)
    tm = None
    for c in cands:
        if _fused_vmem_estimate(c, k0_pad, weights, biases, n_out) <= budget:
            tm = c
            break
    if tm is None:
        return None
    if n_cores >= 2 and m > 8 and pl.cdiv(m, tm) < n_cores:
        tm = max(8, _round_up(pl.cdiv(m, n_cores), 8))
    return tm


# --------------------------------------------------------------------------
# fused whole-stack kernel (weights resident in VMEM, grid over M only)
# --------------------------------------------------------------------------
def _make_mlp_kernel(n_layers):
    def kernel(x_ref, *args):
        # args = (w0, b0, w1, b1, ..., out_ref)
        o_ref = args[-1]
        h = x_ref[...]                                     # (tm, K0) bf16 tile
        for l in range(n_layers):                          # static unroll
            w_ref = args[2 * l]                            # (K, N) bf16, resident
            b_ref = args[2 * l + 1]                        # (1, N) f32,  resident
            acc = jnp.dot(h, w_ref[...],
                          preferred_element_type=jnp.float32)   # MXU, f32 acc
            act = jnp.maximum(acc + b_ref[...], 0.0)       # bias + ReLU in f32
            # Carry the inter-layer activation in bf16 (next dot consumes bf16
            # anyway); keep the final layer's result in f32 for the output.
            h = act if l == n_layers - 1 else act.astype(jnp.bfloat16)
        o_ref[...] = h.astype(o_ref.dtype)
    return kernel


def _fused_mlp_call(xb, weights, biases, *, tm, vmem_budget):
    m, k0_pad = xb.shape
    n_out = int(weights[-1].shape[1])
    n_layers = len(weights)
    grid = (pl.cdiv(m, tm),)

    # Activation tile is pipelined; params live whole in VMEM (single copy,
    # no per-step DMA, no double buffering).
    resident = pl.BlockSpec(memory_space=pltpu.MemorySpace.VMEM)
    in_specs = [pl.BlockSpec((tm, k0_pad), lambda i: (i, 0))]
    flat_inputs = [xb]
    for w, b in zip(weights, biases):
        in_specs += [resident, resident]
        flat_inputs += [w, b]
    out_specs = pl.BlockSpec((tm, n_out), lambda i: (i, 0))

    flops = sum(2 * m * int(w.shape[0]) * int(w.shape[1]) for w in weights)
    bytes_accessed = (int(xb.size) * xb.dtype.itemsize
                      + sum(int(w.size) * w.dtype.itemsize for w in weights)
                      + sum(int(b.size) * b.dtype.itemsize for b in biases)
                      + m * n_out * 4)

    est = _fused_vmem_estimate(tm, k0_pad, weights, biases, n_out)
    vmem_limit = int(min(vmem_budget, max(est * 3 // 2, 32 * 1024 * 1024)))

    return pl.pallas_call(
        _make_mlp_kernel(n_layers),
        out_shape=jax.ShapeDtypeStruct((m, n_out), jnp.float32),
        grid_spec=pltpu.PrefetchScalarGridSpec(
            num_scalar_prefetch=0,
            grid=grid,
            in_specs=in_specs,
            out_specs=out_specs,
        ),
        compiler_params=pltpu.CompilerParams(
            dimension_semantics=("parallel",),
            vmem_limit_bytes=vmem_limit,
        ),
        cost_estimate=pl.CostEstimate(
            flops=int(flops), transcendentals=0,
            bytes_accessed=int(bytes_accessed)),
    )(*flat_inputs)


# --------------------------------------------------------------------------
# tiled per-layer fallback (used when the resident-weight stack exceeds VMEM)
# --------------------------------------------------------------------------
def _linear_relu_kernel(x_ref, w_ref, b_ref, o_ref, acc_ref):
    @pl.when(pl.program_id(2) == 0)
    def _():
        acc_ref[...] = jnp.zeros_like(acc_ref)

    acc_ref[...] += jnp.dot(x_ref[...], w_ref[...],
                            preferred_element_type=jnp.float32)

    @pl.when(pl.program_id(2) == pl.num_programs(2) - 1)
    def _():
        o_ref[...] = jnp.maximum(acc_ref[...] + b_ref[...], 0.0
                                 ).astype(o_ref.dtype)


def _tiled_linear_relu(x, w, b, out_dtype, *, tm=256, tn=512, tk=512):
    m, k = x.shape
    _, n = w.shape
    tm_ = min(tm, m if m <= 8 else _round_up(m, 8))
    tn_ = min(tn, n)                     # n is padded to a multiple of 128
    tk_ = min(tk, k)                     # k is padded to a multiple of 128
    grid = (pl.cdiv(m, tm_), pl.cdiv(n, tn_), pl.cdiv(k, tk_))
    return pl.pallas_call(
        _linear_relu_kernel,
        out_shape=jax.ShapeDtypeStruct((m, n), out_dtype),
        grid_spec=pltpu.PrefetchScalarGridSpec(
            num_scalar_prefetch=0,
            grid=grid,
            in_specs=[
                pl.BlockSpec((tm_, tk_), lambda i, j, kx: (i, kx)),
                pl.BlockSpec((tk_, tn_), lambda i, j, kx: (kx, j)),
                pl.BlockSpec((1, tn_), lambda i, j, kx: (0, j)),
            ],
            out_specs=pl.BlockSpec((tm_, tn_), lambda i, j, kx: (i, j)),
            scratch_shapes=[pltpu.VMEM((tm_, tn_), jnp.float32)],
        ),
        compiler_params=pltpu.CompilerParams(
            dimension_semantics=("parallel", "parallel", "arbitrary"),
        ),
    )(x, w, b)


# --------------------------------------------------------------------------
# dispatch: fused whole-stack path when it fits VMEM, else tiled per layer
# --------------------------------------------------------------------------
def mlp_stack(x, weights, biases, *, force_tiled=False):
    """x: (M, K0) f32.  weights[l]: (K_pad, N_pad) bf16 (pre-transposed,
    pre-padded).  biases[l]: (1, N_pad) f32.  Returns (M, N_pad_last) f32."""
    m, k0 = x.shape
    k0_pad = int(weights[0].shape[0])
    xb = x.astype(jnp.bfloat16)                      # bf16 activations end-to-end
    if k0_pad != k0:                                 # lane-dense first matmul
        xb = jnp.pad(xb, ((0, 0), (0, k0_pad - k0)))
    n_out = int(weights[-1].shape[1])

    budget = int(_vmem_capacity_bytes() * 0.8)       # headroom under physical VMEM
    n_cores = _num_tensorcores()
    tm = (None if force_tiled else
          _choose_fused_tm(m, k0_pad, weights, biases, n_out, budget, n_cores))

    if tm is not None:
        return _fused_mlp_call(xb, weights, biases, tm=tm, vmem_budget=budget)

    # Fallback: resident-weight stack does not fit VMEM -> tile each layer
    # (intermediate activations go back to HBM in bf16, final layer in f32).
    h = xb
    for l, (w, b) in enumerate(zip(weights, biases)):
        last = l == len(weights) - 1
        h = _tiled_linear_relu(h, w, b, jnp.float32 if last else jnp.bfloat16)
    return h


# --------------------------------------------------------------------------
# parameter init / one-time layout prep / forward
# --------------------------------------------------------------------------
def init_mlp_params(key, in_size, layer_sizes):
    """he_normal weights (std = sqrt(2 / fan_in)), zero biases.
    Weights stored PyTorch-style (out, in), f32 — mirrors nn.Linear."""
    params = []
    for out_size in layer_sizes:
        key, wk = jax.random.split(key)
        std = jnp.sqrt(2.0 / in_size)
        w = jax.random.normal(wk, (out_size, in_size), dtype=jnp.float32) * std
        b = jnp.zeros((out_size,), dtype=jnp.float32)
        params.append((w, b))
        in_size = out_size
    return params


def prepare_mlp_params(params, in_size, lane_align=128):
    """One-time layout prep (hoisted out of the forward pass): transpose to
    (in, out), zero-pad feature dims to multiples of `lane_align` (lane-dense
    loads/stores; 128 suits all gens, 256 can be used on v6e/v7x for full MXU
    passes), cast weights to bf16, biases to (1, N_pad) f32.  Zero padding
    keeps the math exact."""
    weights, biases = [], []
    k = in_size
    for w, b in params:
        n = w.shape[0]
        k_pad = _round_up(k, lane_align)
        n_pad = _round_up(n, lane_align)
        w_t = jnp.zeros((k_pad, n_pad), dtype=jnp.float32).at[:k, :n].set(w.T)
        b_p = jnp.zeros((1, n_pad), dtype=jnp.float32).at[0, :n].set(b)
        weights.append(w_t.astype(jnp.bfloat16))
        biases.append(b_p)
        k = n
    return tuple(weights), tuple(biases)


@functools.partial(jax.jit, static_argnames=("out_features", "force_tiled"))
def mlp_block_forward(x, weights, biases, out_features, force_tiled=False):
    """Forward pass of MLPBlock: (Linear -> ReLU) stack, then slice off the
    zero-padded output columns."""
    y = mlp_stack(x, weights, biases, force_tiled=force_tiled)
    return y[:, :out_features]


def mlp_block_reference(x, params, matmul_dtype=jnp.float32):
    """Pure-JAX reference matching PyTorch semantics (optionally with the same
    bf16-matmul / f32-accumulate precision as the kernel)."""
    h = x
    for w, b in params:
        acc = jnp.dot(h.astype(matmul_dtype), w.T.astype(matmul_dtype),
                      preferred_element_type=jnp.float32)
        h = jnp.maximum(acc + b, 0.0)
    return h


# --------------------------------------------------------------------------
# demo / self-test
# --------------------------------------------------------------------------
if __name__ == "__main__":
    key = jax.random.PRNGKey(0)
    key, xk = jax.random.split(key)

    batch = 64
    in_size = 32
    layer_sizes = (64, 32)

    x = jax.random.normal(xk, (batch, in_size), dtype=jnp.float32)
    params = init_mlp_params(key, in_size, layer_sizes)
    weights, biases = prepare_mlp_params(params, in_size)

    # Fused resident-weight path (default for small/medium MLPs).
    out = mlp_block_forward(x, weights, biases, out_features=layer_sizes[-1])
    out = jax.block_until_ready(out)
    assert out.shape == (batch, layer_sizes[-1])

    # References: same matmul precision as the kernel (bf16 operands, f32
    # accumulation), and the exact f32 PyTorch semantics (looser tolerance
    # because weights are stored in bf16).
    ref_bf16 = mlp_block_reference(x, params, matmul_dtype=jnp.bfloat16)
    ref_f32 = mlp_block_reference(x, params)
    assert jnp.allclose(out, ref_bf16, atol=2e-3, rtol=2e-3), \
        "fused path: mismatch vs bf16-matmul reference"
    assert jnp.allclose(out, ref_f32, atol=1e-1, rtol=1e-1), \
        "fused path: mismatch vs f32 reference"

    # Also exercise the tiled fallback path (used for large MLPs whose
    # resident-weight stack exceeds VMEM) to make sure it compiles and agrees.
    out_tiled = mlp_block_forward(x, weights, biases,
                                  out_features=layer_sizes[-1],
                                  force_tiled=True)
    out_tiled = jax.block_until_ready(out_tiled)
    assert out_tiled.shape == (batch, layer_sizes[-1])
    assert jnp.allclose(out_tiled, ref_bf16, atol=2e-3, rtol=2e-3), \
        "tiled fallback: mismatch vs bf16-matmul reference"

    print("KERNEL_OK")
</pallas_src>

<mosaic_0001>
module attributes {stable_mosaic.version = 11 : i64} {
  func.func @kernel(%arg0: i32, %arg1: memref<64x128xbf16, #tpu.memory_space<vmem>>, %arg2: memref<128x128xbf16, #tpu.memory_space<vmem>>, %arg3: memref<1x128xf32, #tpu.memory_space<vmem>>, %arg4: memref<128x128xbf16, #tpu.memory_space<vmem>>, %arg5: memref<1x128xf32, #tpu.memory_space<vmem>>, %arg6: memref<64x128xf32, #tpu.memory_space<vmem>>) attributes {dimension_semantics = [#tpu.dimension_semantics<parallel>], iteration_bounds = array<i64: 1>, scalar_prefetch = 0 : i64, scratch_operands = 0 : i64, tpu.core_type = #tpu.core_type<tc>, window_params = [{transform_indices = @transform_0, window_bounds = array<i64: 64, 128>}, {pipeline_mode = #tpu.pipeline_mode<synchronous>, transform_indices = @transform_1, window_bounds = array<i64: 128, 128>}, {pipeline_mode = #tpu.pipeline_mode<synchronous>, transform_indices = @transform_2, window_bounds = array<i64: 1, 128>}, {pipeline_mode = #tpu.pipeline_mode<synchronous>, transform_indices = @transform_3, window_bounds = array<i64: 128, 128>}, {pipeline_mode = #tpu.pipeline_mode<synchronous>, transform_indices = @transform_4, window_bounds = array<i64: 1, 128>}, {transform_indices = @transform_5, window_bounds = array<i64: 64, 128>}]} {
    %c0 = arith.constant 0 : index
    %c0_0 = arith.constant 0 : index
    %0 = vector.load %arg1[%c0, %c0_0] : memref<64x128xbf16, #tpu.memory_space<vmem>>, vector<64x128xbf16>
    %c0_1 = arith.constant 0 : index
    %c0_2 = arith.constant 0 : index
    %1 = vector.load %arg2[%c0_1, %c0_2] : memref<128x128xbf16, #tpu.memory_space<vmem>>, vector<128x128xbf16>
    %cst = arith.constant dense<0.000000e+00> : vector<64x128xf32>
    %2 = tpu.matmul %0, %1, %cst {dimension_numbers = #tpu.dot_dimension_numbers<[1], [0], [0], [1], [0, 0, 1, 1], [], []>} : vector<64x128xbf16>, vector<128x128xbf16>, vector<64x128xf32> -> vector<64x128xf32>
    %c0_3 = arith.constant 0 : index
    %c0_4 = arith.constant 0 : index
    %3 = vector.load %arg3[%c0_3, %c0_4] : memref<1x128xf32, #tpu.memory_space<vmem>>, vector<1x128xf32>
    %4 = vector.broadcast %3 : vector<1x128xf32> to vector<64x128xf32>
    %5 = arith.addf %2, %4 : vector<64x128xf32>
    %cst_5 = arith.constant 0.000000e+00 : f32
    %6 = vector.broadcast %cst_5 : f32 to vector<64x128xf32>
    %7 = arith.maximumf %5, %6 : vector<64x128xf32>
    %8 = arith.truncf %7 : vector<64x128xf32> to vector<64x128xbf16>
    %c0_6 = arith.constant 0 : index
    %c0_7 = arith.constant 0 : index
    %9 = vector.load %arg4[%c0_6, %c0_7] : memref<128x128xbf16, #tpu.memory_space<vmem>>, vector<128x128xbf16>
    %cst_8 = arith.constant dense<0.000000e+00> : vector<64x128xf32>
    %10 = tpu.matmul %8, %9, %cst_8 {dimension_numbers = #tpu.dot_dimension_numbers<[1], [0], [0], [1], [0, 0, 1, 1], [], []>} : vector<64x128xbf16>, vector<128x128xbf16>, vector<64x128xf32> -> vector<64x128xf32>
    %c0_9 = arith.constant 0 : index
    %c0_10 = arith.constant 0 : index
    %11 = vector.load %arg5[%c0_9, %c0_10] : memref<1x128xf32, #tpu.memory_space<vmem>>, vector<1x128xf32>
    %12 = vector.broadcast %11 : vector<1x128xf32> to vector<64x128xf32>
    %13 = arith.addf %10, %12 : vector<64x128xf32>
    %cst_11 = arith.constant 0.000000e+00 : f32
    %14 = vector.broadcast %cst_11 : f32 to vector<64x128xf32>
    %15 = arith.maximumf %13, %14 : vector<64x128xf32>
    %c0_12 = arith.constant 0 : index
    %c0_13 = arith.constant 0 : index
    %16 = vector.load %arg6[%c0_12, %c0_13] : memref<64x128xf32, #tpu.memory_space<vmem>>, vector<64x128xf32>
    tpu.vector_store %arg6[%c0_12, %c0_13], %15 {strides = array<i32>} : memref<64x128xf32, #tpu.memory_space<vmem>>, vector<64x128xf32>,
    return
  }
  func.func @transform_0(%arg0: i32) -> (i32, i32) {
    %c0_i32 = arith.constant 0 : i32
    %c0_i32_0 = arith.constant 0 : i32
    return %arg0, %c0_i32 : i32, i32
  }
  func.func @transform_1(%arg0: i32) -> (i32, i32) {
    %c0_i32 = arith.constant 0 : i32
    %c0_i32_0 = arith.constant 0 : i32
    %c0_i32_1 = arith.constant 0 : i32
    return %c0_i32, %c0_i32_0 : i32, i32
  }
  func.func @transform_2(%arg0: i32) -> (i32, i32) {
    %c0_i32 = arith.constant 0 : i32
    %c0_i32_0 = arith.constant 0 : i32
    %c0_i32_1 = arith.constant 0 : i32
    return %c0_i32, %c0_i32_0 : i32, i32
  }
  func.func @transform_3(%arg0: i32) -> (i32, i32) {
    %c0_i32 = arith.constant 0 : i32
    %c0_i32_0 = arith.constant 0 : i32
    %c0_i32_1 = arith.constant 0 : i32
    return %c0_i32, %c0_i32_0 : i32, i32
  }
  func.func @transform_4(%arg0: i32) -> (i32, i32) {
    %c0_i32 = arith.constant 0 : i32
    %c0_i32_0 = arith.constant 0 : i32
    %c0_i32_1 = arith.constant 0 : i32
    return %c0_i32, %c0_i32_0 : i32, i32
  }
  func.func @transform_5(%arg0: i32) -> (i32, i32) {
    %c0_i32 = arith.constant 0 : i32
    %c0_i32_0 = arith.constant 0 : i32
    return %arg0, %c0_i32 : i32, i32
  }
}

</mosaic_0001>

<bundles_post_ra>
// kernel: mlp_block_forward.1
= control target key start
LH: loop header
LB: loop body
LE: loop exit
PB: predicated region body
PF: predicated region fallthrough
CT: control target
= control target key end

     0   :  { %s591_s1 = inlined_call_operand.vmem [shape: bf16[128,128], index: 1, kind: input, shape index: {}]   ;;  %s592_s0 = inlined_call_operand.vmem [shape: bf16[64,128], index: 0, kind: input, shape index: {}]   ;;  %s593_s3 = inlined_call_operand.vmem [shape: bf16[128,128], index: 3, kind: input, shape index: {}]   ;;  %s594_s2 = inlined_call_operand.vmem [shape: f32[1,128], index: 2, kind: input, shape index: {}]   ;;  %s595_s4 = inlined_call_operand.vmem [shape: f32[1,128], index: 4, kind: input, shape index: {}]   ;;  %s596_s5 = inlined_call_operand.vmem [shape: f32[64,128], index: 5, kind: output, shape index: {}]  }
   0x1   :  { %v451_v0 = vld [vmem:[%s591_s1] sm:$0xff]   ;;  %v452_v1 = vld [vmem:[%s591_s1 + $0x8] sm:$0xff]   ;;  %v453_v2 = vld [vmem:[%s591_s1 + $0x10] sm:$0xff]  }
   0x2   :  { %403 = vmatprep.subr.bf16.mxu0 %v451_v0  ;;  %v454_v3 = vld [vmem:[%s591_s1 + $0x18] sm:$0xff]   ;;  %v459_v4 = vld [vmem:[%s592_s0] sm:$0xff]   ;;  %v464_v7 = vld [vmem:[%s593_s3 + $0x8] sm:$0xff]  }
   0x3   :  { %404 = vmatpush3.bf16.msra.mxu0 %v451_v0  ;;  %419 = vmatprep.mubr.bf16.mxu0 %v459_v4  ;;  %v455_v5 = vld [vmem:[%s591_s1 + $0x20] sm:$0xff]   ;;  %v456_v8 = vld [vmem:[%s591_s1 + $0x28] sm:$0xff]   ;;  %v465_v9 = vld [vmem:[%s593_s3 + $0x10] sm:$0xff]  }
   0x4   :  { %405 = vmatprep.subr.bf16.mxu0 %v452_v1  ;;  %v463_v6 = vld [vmem:[%s593_s3] sm:$0xff]   ;;  %v457_v10 = vld [vmem:[%s591_s1 + $0x30] sm:$0xff]   ;;  %v466_v11 = vld [vmem:[%s593_s3 + $0x18] sm:$0xff]  }
   0x5   :  { %427 = vmatprep.subr.bf16.mxu1 %v463_v6  ;;  %v458_v12 = vld [vmem:[%s591_s1 + $0x38] sm:$0xff]   ;;  %v467_v13 = vld [vmem:[%s593_s3 + $0x20] sm:$0xff]   ;;  %v468_v14 = vld [vmem:[%s593_s3 + $0x28] sm:$0xff]  }
   0x6   :  { %428 = vmatpush3.bf16.msra.mxu1 %v463_v6  ;;  %v460_v15 = vld [vmem:[%s592_s0 + $0x8] sm:$0xff]   ;;  %v461_v16 = vld [vmem:[%s592_s0 + $0x10] sm:$0xff]   ;;  %v462_v17 = vld [vmem:[%s592_s0 + $0x18] sm:$0xff]  }
   0x7   :  { %406 = vmatpush3.bf16.msra.mxu0 %v452_v1  ;;  %429 = vmatprep.subr.bf16.mxu1 %v464_v7  ;;  %v469_v18 = vld [vmem:[%s593_s3 + $0x30] sm:$0xff]   ;;  %v470_v19 = vld [vmem:[%s593_s3 + $0x38] sm:$0xff]   ;;  %v357_v20 = vld [vmem:[%s594_s2] ss:$0 sm:$0xff] }
   0x8   :  { %407 = vmatprep.subr.bf16.mxu0 %v453_v2  ;;  %v370_v49 = vld [vmem:[%s595_s4] ss:$0 sm:$0xff] }
   0xa   :  { %430 = vmatpush3.bf16.msra.mxu1 %v464_v7 }
   0xb   :  { %408 = vmatpush3.bf16.msra.mxu0 %v453_v2  ;;  %431 = vmatprep.subr.bf16.mxu1 %v465_v9 }
   0xc   :  { %409 = vmatprep.subr.bf16.mxu0 %v454_v3 }
   0xe   :  { %432 = vmatpush3.bf16.msra.mxu1 %v465_v9 }
   0xf   :  { %410 = vmatpush3.bf16.msra.mxu0 %v454_v3  ;;  %433 = vmatprep.subr.bf16.mxu1 %v466_v11 }
  0x10   :  { %411 = vmatprep.subr.bf16.mxu0 %v455_v5 }
  0x12   :  { %434 = vmatpush3.bf16.msra.mxu1 %v466_v11 }
  0x13   :  { %412 = vmatpush3.bf16.msra.mxu0 %v455_v5  ;;  %435 = vmatprep.subr.bf16.mxu1 %v467_v13 }
  0x14   :  { %413 = vmatprep.subr.bf16.mxu0 %v456_v8 }
  0x16   :  { %436 = vmatpush3.bf16.msra.mxu1 %v467_v13 }
  0x17   :  { %414 = vmatpush3.bf16.msra.mxu0 %v456_v8  ;;  %437 = vmatprep.subr.bf16.mxu1 %v468_v14 }
  0x18   :  { %415 = vmatprep.subr.bf16.mxu0 %v457_v10 }
  0x1a   :  { %438 = vmatpush3.bf16.msra.mxu1 %v468_v14 }
  0x1b   :  { %416 = vmatpush3.bf16.msra.mxu0 %v457_v10  ;;  %439 = vmatprep.subr.bf16.mxu1 %v469_v18 }
  0x1c   :  { %417 = vmatprep.subr.bf16.mxu0 %v458_v12 }
  0x1e   :  { %440 = vmatpush3.bf16.msra.mxu1 %v469_v18 }
  0x1f   :  { %418 = vmatpush3.bf16.msra.mxu0 %v458_v12  ;;  %441 = vmatprep.subr.bf16.mxu1 %v470_v19 }
  0x22   :  { %420 = vmatmul.mubr.bf16.vlgmr.msra.gmra.mrb[0].mxu0 %v460_v15  ;;  %442 = vmatpush3.bf16.msra.mxu1 %v470_v19 }
  0x23   :  { %423 = vmatprep.mubr.bf16.mxu0 %v461_v16 }
  0x2a   :  { %424 = vmatmul.mubr.bf16.gmra.mrb[4].mxu0 %v462_v17 }
  0xf5   :  { %v421_v21 = vpop.f32.mrb[0].mxu0 }
  0xf6   :  { %v167_v22 = vadd.f32 %v421_v21, %v357_v20  ;;  %v158_v23 = vpop.f32.mrb[1].mxu0 }
  0xf7   :  { %v159_v24 = vadd.f32 %v357_v20, %v158_v23  ;;  %v422_v25 = vpop.f32.mrb[2].mxu0 }
  0xf8   :  { %v170_v26 = vadd.f32 %v422_v25, %v357_v20  ;;  %v161_v27 = vpop.f32.mrb[3].mxu0  ;;  %v191_v29 = vmax.f32 %v167_v22, 0.0 }
  0xf9   :  { %v162_v28 = vadd.f32 %v357_v20, %v161_v27  ;;  %v189_v31 = vmax.f32 %v159_v24, 0.0 }
  0xfa   :  { %v192_v30 = vmax.f32 %v170_v26, 0.0 }
  0xfb   :  { %v190_v32 = vmax.f32 %v162_v28, 0.0 }
  0xfc   :  { %v198_v33 = vpack.c.bf16 %v192_v30, %v191_v29 }
  0xfd   :  { %v425_v34 = vpop.f32.mrb[4].mxu0  ;;  %v197_v35 = vpack.c.bf16 %v190_v32, %v189_v31 }
  0xfe   :  { %v183_v36 = vadd.f32 %v425_v34, %v357_v20  ;;  %v174_v37 = vpop.f32.mrb[5].mxu0 }
  0xff   :  { %v175_v38 = vadd.f32 %v357_v20, %v174_v37  ;;  %v426_v39 = vpop.f32.mrb[6].mxu0  ;;  %443 = vmatprep.mubr.bf16.mxu1 %v197_v35 }
 0x100   :  { %v186_v40 = vadd.f32 %v426_v39, %v357_v20  ;;  %v177_v41 = vpop.f32.mrb[7].mxu0  ;;  %444 = vmatmul.mubr.bf16.vlgmr.msra.gmra.mrb[0].mxu1 %v198_v33  ;;  %v195_v43 = vmax.f32 %v183_v36, 0.0 }
 0x101   :  { %v178_v42 = vadd.f32 %v357_v20, %v177_v41  ;;  %v193_v45 = vmax.f32 %v175_v38, 0.0 }
 0x102   :  { %v196_v44 = vmax.f32 %v186_v40, 0.0 }
 0x103   :  { %v194_v46 = vmax.f32 %v178_v42, 0.0 }
 0x104   :  { %v200_v47 = vpack.c.bf16 %v196_v44, %v195_v43 }
 0x105   :  { %v199_v48 = vpack.c.bf16 %v194_v46, %v193_v45 }
 0x107   :  { %447 = vmatprep.mubr.bf16.mxu1 %v199_v48 }
 0x108   :  { %448 = vmatmul.mubr.bf16.gmra.mrb[4].mxu1 %v200_v47 }
 0x1d3   :  { %v445_v50 = vpop.f32.mrb[0].mxu1 }
 0x1d4   :  { %v315_v51 = vadd.f32 %v445_v50, %v370_v49  ;;  %v306_v52 = vpop.f32.mrb[1].mxu1 }
 0x1d5   :  { %v307_v53 = vadd.f32 %v370_v49, %v306_v52  ;;  %v446_v54 = vpop.f32.mrb[2].mxu1 }
 0x1d6   :  { %v339_v55 = vmax.f32 %v315_v51, 0.0  ;;  %v318_v56 = vadd.f32 %v446_v54, %v370_v49  ;;  %v309_v57 = vpop.f32.mrb[3].mxu1 }
 0x1d7   :  { %v337_v58 = vmax.f32 %v307_v53, 0.0  ;;  %v310_v59 = vadd.f32 %v370_v49, %v309_v57 }
 0x1d8   :  { %347 = vst [vmem:[%s596_s5 + $0x10] sm:$0xff] %v339_v55  ;;  %v340_v60 = vmax.f32 %v318_v56, 0.0 }
 0x1d9   :  { %345 = vst [vmem:[%s596_s5] sm:$0xff] %v337_v58  ;;  %v338_v61 = vmax.f32 %v310_v59, 0.0 }
 0x1da   :  { %348 = vst [vmem:[%s596_s5 + $0x18] sm:$0xff] %v340_v60 }
 0x1db   :  { %346 = vst [vmem:[%s596_s5 + $0x8] sm:$0xff] %v338_v61  ;;  %v449_v62 = vpop.f32.mrb[4].mxu1 }
 0x1dc   :  { %v331_v63 = vadd.f32 %v449_v62, %v370_v49  ;;  %v322_v0 = vpop.f32.mrb[5].mxu1 }
 0x1dd   :  { %v323_v1 = vadd.f32 %v370_v49, %v322_v0  ;;  %v450_v2 = vpop.f32.mrb[6].mxu1 }
 0x1de   :  { %v343_v3 = vmax.f32 %v331_v63, 0.0  ;;  %v334_v4 = vadd.f32 %v450_v2, %v370_v49  ;;  %v325_v5 = vpop.f32.mrb[7].mxu1 }
 0x1df   :  { %v341_v6 = vmax.f32 %v323_v1, 0.0  ;;  %v326_v7 = vadd.f32 %v370_v49, %v325_v5 }
 0x1e0   :  { %351 = vst [vmem:[%s596_s5 + $0x30] sm:$0xff] %v343_v3  ;;  %v344_v8 = vmax.f32 %v334_v4, 0.0 }
 0x1e1   :  { %349 = vst [vmem:[%s596_s5 + $0x20] sm:$0xff] %v341_v6  ;;  %v342_v9 = vmax.f32 %v326_v7, 0.0 }
 0x1e2   :  { %352 = vst [vmem:[%s596_s5 + $0x38] sm:$0xff] %v344_v8 }
 0x1e3   :  { %350 = vst [vmem:[%s596_s5 + $0x28] sm:$0xff] %v342_v9 }

</bundles_post_ra>
